<compile_context>
chip_gen: v6e
topology: v6e:2x2x1
jax: 0.10.0
libtpu: 0.0.40
codegen_flags: <defaults>
</compile_context>

<pallas_src>
import math

import jax
import jax.numpy as jnp
import numpy as np
from jax.experimental import pallas as pl
from jax.experimental.pallas import tpu as pltpu


# ----------------------------------------------------------------------------
# Pallas kernel: fused linear-score (+ D-chunk accumulate) + mask + softmax.
# ----------------------------------------------------------------------------
def _linear_seq_attn_kernel(x_ref, w_ref, mask_ref, out_ref, acc_ref):
    """x_ref: (TB, L, TD); w_ref: (1, TD); mask_ref/out_ref/acc_ref: (TB, L)."""
    k = pl.program_id(1)

    @pl.when(k == 0)
    def _():
        acc_ref[...] = jnp.zeros_like(acc_ref)

    # Partial scores for this D chunk (upcast to f32 for accumulation).
    x = x_ref[...].astype(jnp.float32)              # (TB, L, TD)
    w = w_ref[...].astype(jnp.float32)              # (1, TD) -> broadcasts
    acc_ref[...] += jnp.sum(x * w, axis=-1)         # (TB, L)

    @pl.when(k == pl.num_programs(1) - 1)
    def _():
        scores = acc_ref[...]
        # bias omitted on purpose: softmax(s + c) == softmax(s).
        masked = mask_ref[...] != 0.0               # 1.0 == masked position
        scores = jnp.where(masked, -jnp.inf, scores)
        # Softmax over the sequence (lane) axis; masked positions -> exactly 0.
        # A fully-masked row yields NaN, matching the PyTorch reference.
        m = jnp.max(scores, axis=-1, keepdims=True)
        e = jnp.exp(scores - m)
        s = jnp.sum(e, axis=-1, keepdims=True)
        out_ref[...] = (e / s).astype(out_ref.dtype)


# ----------------------------------------------------------------------------
# Block-size heuristic (VMEM budget + megacore-friendly batch grid).
# ----------------------------------------------------------------------------
def _choose_blocks(B, L, D, itemsize, x_budget_bytes=12 * 1024 * 1024):
    def x_bytes(tb_, td_):
        return 2 * tb_ * L * td_ * itemsize        # double-buffered x block

    # Batch block: full B for tiny batches (block dim == array dim is legal),
    # otherwise a multiple of 8 (sublane tile of the (TB, L) output block).
    if B <= 8:
        tb = B if B < 8 else 8
    else:
        tb = 8
        # Grow while the full-D block fits the budget and the batch grid keeps
        # >= 2 steps (so v7x megacore has something to shard).
        while (tb * 2 <= 64
               and x_bytes(tb * 2, D) <= x_budget_bytes
               and pl.cdiv(B, tb * 2) >= 2):
            tb *= 2

    # D-chunked reduction only when the full-D block overflows the budget and
    # D is cleanly 128-divisible (BlockSpec last dim must be 128-divisible or
    # equal to the full array dim).
    td = D
    if x_bytes(tb, td) > x_budget_bytes and D % 128 == 0:
        td = 128
        while D % (td * 2) == 0 and x_bytes(tb, td * 2) <= x_budget_bytes:
            td *= 2
    return tb, td


# ----------------------------------------------------------------------------
# Wrapper: no padding / no dtype-forcing of x; bias unused (softmax-invariant).
# ----------------------------------------------------------------------------
def linear_seq_attn(x, x_mask, weight, bias=None):
    """x: (B, L, D); x_mask: (B, L) bool (True = masked). Returns alpha (B, L)."""
    del bias  # softmax is invariant to a constant added to every score
    B, L, D = x.shape
    tb, td = _choose_blocks(B, L, D, x.dtype.itemsize)
    grid = (pl.cdiv(B, tb), D // td)

    w_row = jnp.asarray(weight, jnp.float32).reshape(1, D)
    mask_f = x_mask.astype(jnp.float32)   # tiny (B, L) stream; x untouched

    return pl.pallas_call(
        _linear_seq_attn_kernel,
        out_shape=jax.ShapeDtypeStruct((B, L), x.dtype),
        grid=grid,
        in_specs=[
            pl.BlockSpec((tb, L, td), lambda i, k: (i, 0, k)),   # x block
            pl.BlockSpec((1, td), lambda i, k: (0, k)),          # weight chunk
            pl.BlockSpec((tb, L), lambda i, k: (i, 0)),          # mask block
        ],
        out_specs=pl.BlockSpec((tb, L), lambda i, k: (i, 0)),
        scratch_shapes=[pltpu.VMEM((tb, L), jnp.float32)],       # f32 scores acc
        compiler_params=pltpu.CompilerParams(
            dimension_semantics=("parallel", "arbitrary"),
            vmem_limit_bytes=32 * 1024 * 1024,
        ),
    )(x, w_row, mask_f)


# ----------------------------------------------------------------------------
# Pure-JAX reference (mirrors the PyTorch forward) and parameter init.
# ----------------------------------------------------------------------------
def linear_seq_attn_ref(x, x_mask, weight, bias):
    w = jnp.asarray(weight, jnp.float32).reshape(-1)
    scores = jnp.einsum("bld,d->bl", x.astype(jnp.float32), w,
                        precision=jax.lax.Precision.HIGHEST)
    scores = scores + jnp.asarray(bias, jnp.float32).reshape(())
    scores = jnp.where(x_mask, -jnp.inf, scores)
    return jax.nn.softmax(scores, axis=-1)


def init_params(key, input_size):
    # mimics nn.Linear default init U(-1/sqrt(fan_in), 1/sqrt(fan_in))
    bound = 1.0 / math.sqrt(input_size)
    kw, kb = jax.random.split(key)
    weight = jax.random.uniform(kw, (1, input_size), jnp.float32, -bound, bound)
    bias = jax.random.uniform(kb, (1,), jnp.float32, -bound, bound)
    return weight, bias


# ----------------------------------------------------------------------------
if __name__ == "__main__":
    key = jax.random.PRNGKey(0)
    k1, k2 = jax.random.split(key)

    # --- test 1: tiny shapes from the module docstring ---------------------
    batch, seq, hidden = 2, 8, 32
    kx, kp = jax.random.split(k1)
    x = jax.random.normal(kx, (batch, seq, hidden), jnp.float32)
    lengths = jnp.array([seq, seq - 3], jnp.int32)     # True = padding position
    x_mask = jnp.arange(seq)[None, :] >= lengths[:, None]
    weight, bias = init_params(kp, hidden)

    alpha = jax.block_until_ready(linear_seq_attn(x, x_mask, weight, bias))
    assert alpha.shape == (batch, seq), alpha.shape

    ref = jax.block_until_ready(linear_seq_attn_ref(x, x_mask, weight, bias))
    np.testing.assert_allclose(np.asarray(alpha), np.asarray(ref),
                               rtol=5e-5, atol=1e-6)
    np.testing.assert_allclose(np.asarray(alpha).sum(-1),
                               np.ones(batch, np.float32), rtol=1e-5)
    assert float(np.asarray(alpha)[1, seq - 1]) == 0.0   # masked -> exactly 0

    # --- test 2: multi-step batch grid with a partial boundary block -------
    B2, L2, D2 = 20, 128, 256
    kx2, kl2, kp2 = jax.random.split(k2, 3)
    x2 = jax.random.normal(kx2, (B2, L2, D2), jnp.float32)
    lengths2 = jax.random.randint(kl2, (B2,), 1, L2 + 1)
    mask2 = jnp.arange(L2)[None, :] >= lengths2[:, None]
    w2, b2 = init_params(kp2, D2)

    alpha2 = jax.block_until_ready(linear_seq_attn(x2, mask2, w2, b2))
    ref2 = jax.block_until_ready(linear_seq_attn_ref(x2, mask2, w2, b2))
    np.testing.assert_allclose(np.asarray(alpha2), np.asarray(ref2),
                               rtol=5e-5, atol=1e-6)

    print("KERNEL_OK")
</pallas_src>

<mosaic_0001>
module attributes {stable_mosaic.version = 11 : i64} {
  func.func @_linear_seq_attn_kernel(%arg0: i32, %arg1: i32, %arg2: memref<2x8x32xf32, #tpu.memory_space<vmem>>, %arg3: memref<1x32xf32, #tpu.memory_space<vmem>>, %arg4: memref<2x8xf32, #tpu.memory_space<vmem>>, %arg5: memref<2x8xf32, #tpu.memory_space<vmem>>, %arg6: memref<2x8xf32, #tpu.memory_space<vmem>>) attributes {dimension_semantics = [#tpu.dimension_semantics<parallel>, #tpu.dimension_semantics<arbitrary>], iteration_bounds = array<i64: 1, 1>, scalar_prefetch = 0 : i64, scratch_operands = 1 : i64, tpu.core_type = #tpu.core_type<tc>, window_params = [{transform_indices = @transform_0, window_bounds = array<i64: 2, 8, 32>}, {transform_indices = @transform_1, window_bounds = array<i64: 1, 32>}, {transform_indices = @transform_2, window_bounds = array<i64: 2, 8>}, {transform_indices = @transform_3, window_bounds = array<i64: 2, 8>}]} {
    %c0_i32 = arith.constant 0 : i32
    %0 = arith.cmpi eq, %arg1, %c0_i32 : i32
    %1 = arith.extui %0 : i1 to i32
    %c0_i32_0 = arith.constant 0 : i32
    %2 = arith.cmpi ne, %1, %c0_i32_0 : i32
    scf.if %2 {
      %cst_11 = arith.constant 0.000000e+00 : f32
      %15 = vector.broadcast %cst_11 : f32 to vector<2x8xf32>
      %c0_12 = arith.constant 0 : index
      %c0_13 = arith.constant 0 : index
      %16 = vector.load %arg6[%c0_12, %c0_13] : memref<2x8xf32, #tpu.memory_space<vmem>>, vector<2x8xf32>
      tpu.vector_store %arg6[%c0_12, %c0_13], %15 {strides = array<i32>} : memref<2x8xf32, #tpu.memory_space<vmem>>, vector<2x8xf32>,
    } else {
    }
    %c0 = arith.constant 0 : index
    %c0_1 = arith.constant 0 : index
    %c0_2 = arith.constant 0 : index
    %3 = vector.load %arg2[%c0, %c0_1, %c0_2] : memref<2x8x32xf32, #tpu.memory_space<vmem>>, vector<2x8x32xf32>
    %c0_3 = arith.constant 0 : index
    %c0_4 = arith.constant 0 : index
    %4 = vector.load %arg3[%c0_3, %c0_4] : memref<1x32xf32, #tpu.memory_space<vmem>>, vector<1x32xf32>
    %c0_5 = arith.constant 0 : index
    %c0_6 = arith.constant 0 : index
    %5 = vector.load %arg6[%c0_5, %c0_6] : memref<2x8xf32, #tpu.memory_space<vmem>>, vector<2x8xf32>
    %6 = vector.shape_cast %4 : vector<1x32xf32> to vector<1x1x32xf32>
    %7 = vector.broadcast %6 : vector<1x1x32xf32> to vector<2x8x32xf32>
    %8 = arith.mulf %3, %7 : vector<2x8x32xf32>
    %cst = arith.constant dense<0.000000e+00> : vector<2x8xf32>
    %9 = vector.multi_reduction <add>, %8, %cst [2] : vector<2x8x32xf32> to vector<2x8xf32>
    %10 = arith.addf %5, %9 : vector<2x8xf32>
    %c0_7 = arith.constant 0 : index
    %c0_8 = arith.constant 0 : index
    %11 = vector.load %arg6[%c0_7, %c0_8] : memref<2x8xf32, #tpu.memory_space<vmem>>, vector<2x8xf32>
    tpu.vector_store %arg6[%c0_7, %c0_8], %10 {strides = array<i32>} : memref<2x8xf32, #tpu.memory_space<vmem>>, vector<2x8xf32>,
    %c0_i32_9 = arith.constant 0 : i32
    %12 = arith.cmpi eq, %arg1, %c0_i32_9 : i32
    %13 = arith.extui %12 : i1 to i32
    %c0_i32_10 = arith.constant 0 : i32
    %14 = arith.cmpi ne, %13, %c0_i32_10 : i32
    scf.if %14 {
      %c0_11 = arith.constant 0 : index
      %c0_12 = arith.constant 0 : index
      %15 = vector.load %arg6[%c0_11, %c0_12] : memref<2x8xf32, #tpu.memory_space<vmem>>, vector<2x8xf32>
      %c0_13 = arith.constant 0 : index
      %c0_14 = arith.constant 0 : index
      %16 = vector.load %arg4[%c0_13, %c0_14] : memref<2x8xf32, #tpu.memory_space<vmem>>, vector<2x8xf32>
      %cst_15 = arith.constant 0.000000e+00 : f32
      %17 = vector.broadcast %cst_15 : f32 to vector<2x8xf32>
      %18 = arith.cmpf one, %16, %17 : vector<2x8xf32>
      %cst_16 = arith.constant 0xFF800000 : f32
      %19 = vector.broadcast %cst_16 : f32 to vector<2x8xf32>
      %20 = arith.select %18, %19, %15 : vector<2x8xi1>, vector<2x8xf32>
      %cst_17 = arith.constant dense<0xFF800000> : vector<2xf32>
      %21 = vector.multi_reduction <maximumf>, %20, %cst_17 [1] : vector<2x8xf32> to vector<2xf32>
      %22 = vector.shape_cast %21 : vector<2xf32> to vector<2x1xf32>
      %23 = vector.broadcast %22 : vector<2x1xf32> to vector<2x8xf32>
      %24 = arith.subf %20, %23 : vector<2x8xf32>
      %25 = math.exp %24 : vector<2x8xf32>
      %cst_18 = arith.constant dense<0.000000e+00> : vector<2xf32>
      %26 = vector.multi_reduction <add>, %25, %cst_18 [1] : vector<2x8xf32> to vector<2xf32>
      %27 = vector.shape_cast %26 : vector<2xf32> to vector<2x1xf32>
      %28 = vector.broadcast %27 : vector<2x1xf32> to vector<2x8xf32>
      %29 = arith.divf %25, %28 : vector<2x8xf32>
      %c0_19 = arith.constant 0 : index
      %c0_20 = arith.constant 0 : index
      %30 = vector.load %arg5[%c0_19, %c0_20] : memref<2x8xf32, #tpu.memory_space<vmem>>, vector<2x8xf32>
      tpu.vector_store %arg5[%c0_19, %c0_20], %29 {strides = array<i32>} : memref<2x8xf32, #tpu.memory_space<vmem>>, vector<2x8xf32>,
    } else {
    }
    return
  }
  func.func @transform_0(%arg0: i32, %arg1: i32) -> (i32, i32, i32) {
    %c0_i32 = arith.constant 0 : i32
    %c0_i32_0 = arith.constant 0 : i32
    return %arg0, %c0_i32, %arg1 : i32, i32, i32
  }
  func.func @transform_1(%arg0: i32, %arg1: i32) -> (i32, i32) {
    %c0_i32 = arith.constant 0 : i32
    %c0_i32_0 = arith.constant 0 : i32
    return %c0_i32, %arg1 : i32, i32
  }
  func.func @transform_2(%arg0: i32, %arg1: i32) -> (i32, i32) {
    %c0_i32 = arith.constant 0 : i32
    %c0_i32_0 = arith.constant 0 : i32
    return %arg0, %c0_i32 : i32, i32
  }
  func.func @transform_3(%arg0: i32, %arg1: i32) -> (i32, i32) {
    %c0_i32 = arith.constant 0 : i32
    %c0_i32_0 = arith.constant 0 : i32
    return %arg0, %c0_i32 : i32, i32
  }
}

</mosaic_0001>

<bundles_post_ra>
// kernel: tpu_custom_call.1
= control target key start
LH: loop header
LB: loop body
LE: loop exit
PB: predicated region body
PF: predicated region fallthrough
CT: control target
= control target key end

     0   :  { %8 = vsyncpa [#allocation4], 0  ;;  %s202_s0 = inlined_call_operand.hbm [shape: f32[2,8,32], index: 0, kind: input, shape index: {}]   ;;  %s203_s1 = inlined_call_operand.vmem [shape: f32[1,32], index: 1, kind: input, shape index: {}]   ;;  %s204_s2 = inlined_call_operand.vmem [shape: f32[2,8], index: 2, kind: input, shape index: {}]   ;;  %s205_s3 = inlined_call_operand.hbm [shape: f32[2,8], index: 3, kind: output, shape index: {}]  }
   0x1   :  { %9 = vsyncpa [#allocation5], 0  ;;  %s160_s12 = smov [#allocation3]  }
   0x2   :  { %s15_s13 = sshll.u32 %s160_s12, 4  ;;  %s16_s13 = int_to_ptr.vmem [resolvable:$true] %s15_s13 }
   0x3   :  { %s124_s14 = scalar_lea.vmem %s16_s13, 256  ;;  %p129_p1 = scmp.lt.s32.totalorder %s16_s13, %s16_s13 }
   0x4   :  { %p125_p0 = scmp.ne.s32.totalorder %s16_s13, %s124_s14  ;;  %p130_p2 = scmp.lt.s32.totalorder %s124_s14, %s124_s14 }
   0x6   :  { %p131_p3 = por %p130_p2, %p129_p1 }
   0x8   :  { %p132_p4 = pnand %p131_p3, %p125_p0 }
   0xa   :  { %135 = shalt.err (!%p132_p4)
}
   0xb   :  { %s161_s15 = smov 128   ;;  %s162_s16 = smov 8  }
   0xc   :  { %21 = dma.hbm_to_vmem [thread:$0]  %s202_s0, 256, %s16_s13, [#allocation4], %s161_s15, %s161_s15, %s162_s16  }
   0xd   :  { %156 = dma.done.wait [#allocation4], 256  }
   0xe   :  { %157 = vsyncadd [#allocation4], 4294967040  ;;  %v35_v0 = vld [vmem:[#allocation3] sm:$0xff]  ;;  %v106_v1 = vld [vmem:[%s203_s1] ss:$0 sm:$0xff]  ;;  %vm47_vm0 = vcmask 261120   ;;  %v56_v8 = vlaneseq }
   0xf   :  { %v36_v2 = vld [vmem:[#allocation3 + $0x8] sm:$0xff]  ;;  %v45_v3 = vmul.f32 %v106_v1, %v35_v0  ;;  %vm33_vm1 = vcmask 58368   ;;  %v163_v7 = vmov 0.0   ;;  %vm66_vm2 = vcmask 1041409   ;;  %v76_v19 = vld [vmem:[%s204_s2] sm:$0x3] }
  0x10   :  { %v46_v4 = vmul.f32 %v106_v1, %v36_v2  ;;  %34 = vst.msk [vmem:[#allocation2] sm:$0x3] %vm33_vm1, %v163_v7  ;;  %v57_v9 = vand.u32 127, %v56_v8  ;;  %v59_v10 = vshrl.u32 %v56_v8, 7  ;;  %vm77_vm3 = vcmp.ne.f32.partialorder %v76_v19, 0.0  ;;  %s164_s21 = smov [#allocation6]  }
  0x11   :  { %v48_v5 = vsel %vm47_vm0, %v45_v3, 0.0  ;;  %s97_s22 = sshll.u32 %s164_s21, 4  ;;  %s98_s22 = int_to_ptr.vmem [resolvable:$true] %s97_s22 }
  0x12   :  { %49 = vadd.xlane.f32.xlu0 %v48_v5  ;;  %v51_v6 = vsel %vm47_vm0, %v46_v4, 0.0  ;;  %v60_v12 = vsub.s32 %v57_v9, %v59_v10  ;;  %s136_s2 = scalar_lea.vmem %s98_s22, 32  ;;  %p141_p6 = scmp.lt.s32.totalorder %s98_s22, %s98_s22 }
  0x13   :  { %p137_p5 = scmp.ne.s32.totalorder %s98_s22, %s136_s2  ;;  %p142_p7 = scmp.lt.s32.totalorder %s136_s2, %s136_s2 }
  0x15   :  { %p143_p8 = por %p142_p7, %p141_p6 }
  0x16   :  { %52 = vadd.xlane.f32.xlu0 %v51_v6 }
  0x17   :  { %v38_v15 = vld [vmem:[#allocation2] sm:$0x3]  ;;  %p144_p9 = pnand %p143_p8, %p137_p5 }
  0x9b   :  { %v50_v11 = vpop.xlane.xlu0 %49 }
  0x9c   :  { %v61_v14 = vrot.slane %v50_v11, %v60_v12 }
  0x9f   :  { %v53_v13 = vpop.xlane.xlu0 %52 }
  0xa0   :  { %v65_v16 = vrot.slane %v53_v13, %v60_v12 }
  0xa2   :  { %v67_v17 = vsel %vm66_vm2, %v65_v16, %v61_v14 }
  0xa3   :  { %v69_v18 = vadd.f32 %v67_v17, %v38_v15 }
  0xa5   :  { %71 = vst.msk [vmem:[#allocation2] sm:$0x3] %vm33_vm1, %v69_v18 }
  0xac   :  { %v75_v20 = vld [vmem:[#allocation2] sm:$0x3] }
  0xad   :  { %v78_v21 = vsel %vm77_vm3, -inf, %v75_v20 }
  0xae   :  { %v79_v22 = vsel %vm33_vm1, %v78_v21, -inf }
  0xaf   :  { %80 = vmax.xlane.f32.xlu1 %v79_v22 }
 0x138   :  { %v81_v23 = vpop.xlane.xlu1 %80 }
 0x139   :  { %v82_v24 = vsub.f32 %v78_v21, %v81_v23 }
 0x13b   :  { %v83_v25 = vmul.f32 1.442695, %v82_v24 }
 0x13d   :  { %112 = vpow2.f32 %v83_v25 }
 0x14a   :  { %v113_v26 = vpop.eup %112 }
 0x14b   :  { %v85_v27 = vsel %vm33_vm1, %v113_v26, 0.0 }
 0x14c   :  { %86 = vadd.xlane.f32.xlu1 %v85_v27 }
 0x1d5   :  { %v87_v28 = vpop.xlane.xlu1 %86 }
 0x1d6   :  { %114 = vrcp.f32 %v87_v28 }
 0x1e3   :  { %v115_v29 = vpop.eup %114 }
 0x1e4   :  { %v89_v30 = vmul.f32 %v115_v29, %v113_v26 }
 0x1e6   :  { %90 = vst.msk [vmem:[#allocation6] sm:$0x3] %vm33_vm1, %v89_v30 }
 0x1e7   :  { %147 = shalt.err (!%p144_p9)
}
 0x1e8   :  { %100 = dma.vmem_to_hbm [thread:$0]  %s98_s22, 32, %s205_s3, [#allocation5]  }
 0x1e9   :  { %158 = dma.done.wait [#allocation5], 32  }
 0x1ea   :  { %159 = vsyncadd [#allocation5], 4294967264 }
 0x1eb   :  { %104 = vsyncpa [#allocation4], 1 }
 0x1ec   :  { %105 = vsyncpa [#allocation5], 1 }

</bundles_post_ra>
